<compile_context>
chip_gen: v7x
topology: tpu7x:2x2x1
jax: 0.10.0
libtpu: 0.0.40
codegen_flags: <defaults>
</compile_context>

<pallas_src>
import jax
import jax.numpy as jnp
from jax.experimental import pallas as pl
from jax.experimental.pallas import tpu as pltpu

N_IN, H1, H2, N_OUT = 60, 4, 2, 1
TILE_B = 8192  # batch rows per grid step (sweet spot 4096-16384 per review)


def _round_up(n, m):
    return ((n + m - 1) // m) * m


def perceptron_kernel(x_ref, w1t_ref, b1_ref, w2t_ref, b2_ref, w3t_ref,
                      b3_ref, o_ref):
    """One batch tile; activations kept batch-on-lane.

    x_ref  : (tile_b, 60) VMEM, streamed per grid step
    w1t_ref: (4, 60)      VMEM, resident (constant index_map)
    b1_ref : (4, 1)   w2t_ref: (2, 4)   b2_ref: (2, 1)
    w3t_ref: (1, 2)   b3_ref: (1, 1)    -- all resident VMEM
    o_ref  : (1, tile_b) VMEM, lane-dense output tile
    """
    x = x_ref[...]                                          # (tile_b, 60) f32

    # ---- layer 1 on the MXU: (4, 60) . (tile_b, 60)^T -> (4, tile_b).
    # Contract-last-with-last (A @ B^T) gives the result directly in
    # batch-on-lane orientation, so no big transpose is needed and the
    # activations below are lane-dense.
    pre1 = jax.lax.dot_general(
        w1t_ref[...], x,
        dimension_numbers=(((1,), (1,)), ((), ())),
        preferred_element_type=jnp.float32)                 # (4, tile_b)
    h1 = jnp.tanh(pre1 + b1_ref[...])                       # stacked dense tanh

    # ---- layer 2: tiny MXU matmul, (2, 4) @ (4, tile_b) -> (2, tile_b).
    pre2 = jnp.dot(w2t_ref[...], h1, preferred_element_type=jnp.float32)
    h2 = jnp.tanh(pre2 + b2_ref[...])

    # ---- layer 3 + sigmoid: (1, 2) @ (2, tile_b) -> (1, tile_b).
    pre3 = jnp.dot(w3t_ref[...], h2, preferred_element_type=jnp.float32)
    z = pre3 + b3_ref[...]
    # sigmoid(z) == 0.5 * (tanh(0.5 z) + 1): single EUP transcendental.
    o_ref[...] = 0.5 * (jnp.tanh(0.5 * z) + 1.0)


@jax.jit
def perceptron_forward(x, params):
    """x: (B, 60) f32 -> (B, 1) f32."""
    w1, b1, w2, b2, w3, b3 = params
    B = x.shape[0]

    # Tile choice: big enough to amortize per-step overhead, small enough to
    # keep >= 2 grid steps for large batches (v7x megacore).  The last dim of
    # the (1, tile_b) output block must be a multiple of 128.
    if B > TILE_B:
        tile_b = min(TILE_B, _round_up(pl.cdiv(B, 2), 128))
    else:
        tile_b = _round_up(B, 128)
    grid_b = pl.cdiv(B, tile_b)

    # Tiny parameter reshapes (a few hundred bytes; negligible).
    w1t = w1.T                       # (4, 60)
    w2t = w2.T                       # (2, 4)
    w3t = w3.T                       # (1, 2)
    b1c = b1.reshape(H1, 1)
    b2c = b2.reshape(H2, 1)
    b3c = b3.reshape(N_OUT, 1)

    def const(shape):                # full-array block, resident across steps
        return pl.BlockSpec(shape, lambda i: (0, 0))

    out = pl.pallas_call(
        perceptron_kernel,
        out_shape=jax.ShapeDtypeStruct((1, B), jnp.float32),
        grid=(grid_b,),
        in_specs=[
            pl.BlockSpec((tile_b, N_IN), lambda i: (i, 0)),  # x: streamed tile
            const((H1, N_IN)),        # w1^T
            const((H1, 1)),           # b1
            const((H2, H1)),          # w2^T
            const((H2, 1)),           # b2
            const((N_OUT, H2)),       # w3^T
            const((N_OUT, 1)),        # b3
        ],
        out_specs=pl.BlockSpec((1, tile_b), lambda i: (0, i)),
        compiler_params=pltpu.CompilerParams(
            dimension_semantics=("parallel",),
        ),
    )(x, w1t, b1c, w2t, b2c, w3t, b3c)

    return out.reshape(B, 1)         # (1, B) -> (B, 1) is a free reshape


def init_params(key):
    """torch.nn.Linear default init: U(-1/sqrt(fan_in), +1/sqrt(fan_in)).

    Weights stored as (in_features, out_features) (transposed vs torch) and
    biases as 1-D (out_features,), so `x @ W + b` matches torch's forward.
    """
    def linear(k, fan_in, fan_out):
        kw, kb = jax.random.split(k)
        bound = 1.0 / jnp.sqrt(float(fan_in))
        w = jax.random.uniform(kw, (fan_in, fan_out), jnp.float32,
                               -bound, bound)
        b = jax.random.uniform(kb, (fan_out,), jnp.float32, -bound, bound)
        return w, b

    k1, k2, k3 = jax.random.split(key, 3)
    w1, b1 = linear(k1, N_IN, H1)
    w2, b2 = linear(k2, H1, H2)
    w3, b3 = linear(k3, H2, N_OUT)
    return (w1, b1, w2, b2, w3, b3)


def reference_forward(x, params):
    w1, b1, w2, b2, w3, b3 = params
    hp = jax.lax.Precision.HIGHEST
    h = jnp.tanh(jnp.dot(x, w1, precision=hp) + b1)
    h = jnp.tanh(jnp.dot(h, w2, precision=hp) + b2)
    return jax.nn.sigmoid(jnp.dot(h, w3, precision=hp) + b3)


if __name__ == "__main__":
    key = jax.random.PRNGKey(0)
    k_params, k_x1, k_x2, k_x3 = jax.random.split(key, 4)
    params = init_params(k_params)

    # Small batch consistent with the module (batch=8, features=60).
    x_small = jax.random.normal(k_x1, (8, N_IN), dtype=jnp.float32)
    out_small = jax.block_until_ready(perceptron_forward(x_small, params))
    assert out_small.shape == (8, 1)
    assert jnp.allclose(out_small, reference_forward(x_small, params),
                        atol=1e-4, rtol=1e-4), "mismatch vs reference (B=8)"

    # Ragged batch: single partial tile, exercises Pallas edge masking.
    x_rag = jax.random.normal(k_x2, (1111, N_IN), dtype=jnp.float32)
    out_rag = jax.block_until_ready(perceptron_forward(x_rag, params))
    assert out_rag.shape == (1111, 1)
    assert jnp.allclose(out_rag, reference_forward(x_rag, params),
                        atol=1e-4, rtol=1e-4), "mismatch vs reference (B=1111)"

    # Multi-tile batch: grid > 1, resident weights, ragged last tile.
    x_big = jax.random.normal(k_x3, (9000, N_IN), dtype=jnp.float32)
    out_big = jax.block_until_ready(perceptron_forward(x_big, params))
    assert out_big.shape == (9000, 1)
    assert jnp.allclose(out_big, reference_forward(x_big, params),
                        atol=1e-4, rtol=1e-4), "mismatch vs reference (B=9000)"

    print("KERNEL_OK")
</pallas_src>

<mosaic_0001>
module attributes {stable_mosaic.version = 11 : i64} {
  func.func @perceptron_kernel(%arg0: i32, %arg1: memref<128x60xf32, #tpu.memory_space<vmem>>, %arg2: memref<4x60xf32, #tpu.memory_space<vmem>>, %arg3: memref<4x1xf32, #tpu.memory_space<vmem>>, %arg4: memref<2x4xf32, #tpu.memory_space<vmem>>, %arg5: memref<2x1xf32, #tpu.memory_space<vmem>>, %arg6: memref<1x2xf32, #tpu.memory_space<vmem>>, %arg7: memref<1x1xf32, #tpu.memory_space<vmem>>, %arg8: memref<1x128xf32, #tpu.memory_space<vmem>>) attributes {dimension_semantics = [#tpu.dimension_semantics<parallel>], iteration_bounds = array<i64: 1>, scalar_prefetch = 0 : i64, scratch_operands = 0 : i64, tpu.core_type = #tpu.core_type<tc>, window_params = [{transform_indices = @transform_0, window_bounds = array<i64: 128, 60>}, {pipeline_mode = #tpu.pipeline_mode<synchronous>, transform_indices = @transform_1, window_bounds = array<i64: 4, 60>}, {pipeline_mode = #tpu.pipeline_mode<synchronous>, transform_indices = @transform_2, window_bounds = array<i64: 4, 1>}, {pipeline_mode = #tpu.pipeline_mode<synchronous>, transform_indices = @transform_3, window_bounds = array<i64: 2, 4>}, {pipeline_mode = #tpu.pipeline_mode<synchronous>, transform_indices = @transform_4, window_bounds = array<i64: 2, 1>}, {pipeline_mode = #tpu.pipeline_mode<synchronous>, transform_indices = @transform_5, window_bounds = array<i64: 1, 2>}, {pipeline_mode = #tpu.pipeline_mode<synchronous>, transform_indices = @transform_6, window_bounds = array<i64: 1, 1>}, {transform_indices = @transform_7, window_bounds = array<i64: 1, 128>}]} {
    %c0 = arith.constant 0 : index
    %c0_0 = arith.constant 0 : index
    %0 = vector.load %arg1[%c0, %c0_0] : memref<128x60xf32, #tpu.memory_space<vmem>>, vector<128x60xf32>
    %c0_1 = arith.constant 0 : index
    %c0_2 = arith.constant 0 : index
    %1 = vector.load %arg2[%c0_1, %c0_2] : memref<4x60xf32, #tpu.memory_space<vmem>>, vector<4x60xf32>
    %cst = arith.constant dense<0.000000e+00> : vector<4x128xf32>
    %2 = tpu.matmul %1, %0, %cst {dimension_numbers = #tpu.dot_dimension_numbers<[1], [1], [0], [0], [0, 0, 1, 0], [], []>} : vector<4x60xf32>, vector<128x60xf32>, vector<4x128xf32> -> vector<4x128xf32>
    %c0_3 = arith.constant 0 : index
    %c0_4 = arith.constant 0 : index
    %3 = vector.load %arg3[%c0_3, %c0_4] : memref<4x1xf32, #tpu.memory_space<vmem>>, vector<4x1xf32>
    %4 = vector.broadcast %3 : vector<4x1xf32> to vector<4x128xf32>
    %5 = arith.addf %2, %4 : vector<4x128xf32>
    %6 = math.tanh %5 : vector<4x128xf32>
    %c0_5 = arith.constant 0 : index
    %c0_6 = arith.constant 0 : index
    %7 = vector.load %arg4[%c0_5, %c0_6] : memref<2x4xf32, #tpu.memory_space<vmem>>, vector<2x4xf32>
    %cst_7 = arith.constant dense<0.000000e+00> : vector<2x128xf32>
    %8 = tpu.matmul %7, %6, %cst_7 {dimension_numbers = #tpu.dot_dimension_numbers<[1], [0], [0], [1], [0, 0, 1, 1], [], []>} : vector<2x4xf32>, vector<4x128xf32>, vector<2x128xf32> -> vector<2x128xf32>
    %c0_8 = arith.constant 0 : index
    %c0_9 = arith.constant 0 : index
    %9 = vector.load %arg5[%c0_8, %c0_9] : memref<2x1xf32, #tpu.memory_space<vmem>>, vector<2x1xf32>
    %10 = vector.broadcast %9 : vector<2x1xf32> to vector<2x128xf32>
    %11 = arith.addf %8, %10 : vector<2x128xf32>
    %12 = math.tanh %11 : vector<2x128xf32>
    %c0_10 = arith.constant 0 : index
    %c0_11 = arith.constant 0 : index
    %13 = vector.load %arg6[%c0_10, %c0_11] : memref<1x2xf32, #tpu.memory_space<vmem>>, vector<1x2xf32>
    %cst_12 = arith.constant dense<0.000000e+00> : vector<1x128xf32>
    %14 = tpu.matmul %13, %12, %cst_12 {dimension_numbers = #tpu.dot_dimension_numbers<[1], [0], [0], [1], [0, 0, 1, 1], [], []>} : vector<1x2xf32>, vector<2x128xf32>, vector<1x128xf32> -> vector<1x128xf32>
    %c0_13 = arith.constant 0 : index
    %c0_14 = arith.constant 0 : index
    %15 = vector.load %arg7[%c0_13, %c0_14] : memref<1x1xf32, #tpu.memory_space<vmem>>, vector<1x1xf32>
    %16 = vector.broadcast %15 : vector<1x1xf32> to vector<1x128xf32>
    %17 = arith.addf %14, %16 : vector<1x128xf32>
    %cst_15 = arith.constant 5.000000e-01 : f32
    %18 = vector.broadcast %cst_15 : f32 to vector<1x128xf32>
    %19 = arith.mulf %18, %17 : vector<1x128xf32>
    %20 = math.tanh %19 : vector<1x128xf32>
    %cst_16 = arith.constant 1.000000e+00 : f32
    %21 = vector.broadcast %cst_16 : f32 to vector<1x128xf32>
    %22 = arith.addf %20, %21 : vector<1x128xf32>
    %cst_17 = arith.constant 5.000000e-01 : f32
    %23 = vector.broadcast %cst_17 : f32 to vector<1x128xf32>
    %24 = arith.mulf %23, %22 : vector<1x128xf32>
    %c0_18 = arith.constant 0 : index
    %c0_19 = arith.constant 0 : index
    %25 = vector.load %arg8[%c0_18, %c0_19] : memref<1x128xf32, #tpu.memory_space<vmem>>, vector<1x128xf32>
    tpu.vector_store %arg8[%c0_18, %c0_19], %24 {strides = array<i32>} : memref<1x128xf32, #tpu.memory_space<vmem>>, vector<1x128xf32>,
    return
  }
  func.func @transform_0(%arg0: i32) -> (i32, i32) {
    %c0_i32 = arith.constant 0 : i32
    %c0_i32_0 = arith.constant 0 : i32
    return %arg0, %c0_i32 : i32, i32
  }
  func.func @transform_1(%arg0: i32) -> (i32, i32) {
    %c0_i32 = arith.constant 0 : i32
    %c0_i32_0 = arith.constant 0 : i32
    %c0_i32_1 = arith.constant 0 : i32
    return %c0_i32, %c0_i32_0 : i32, i32
  }
  func.func @transform_2(%arg0: i32) -> (i32, i32) {
    %c0_i32 = arith.constant 0 : i32
    %c0_i32_0 = arith.constant 0 : i32
    %c0_i32_1 = arith.constant 0 : i32
    return %c0_i32, %c0_i32_0 : i32, i32
  }
  func.func @transform_3(%arg0: i32) -> (i32, i32) {
    %c0_i32 = arith.constant 0 : i32
    %c0_i32_0 = arith.constant 0 : i32
    %c0_i32_1 = arith.constant 0 : i32
    return %c0_i32, %c0_i32_0 : i32, i32
  }
  func.func @transform_4(%arg0: i32) -> (i32, i32) {
    %c0_i32 = arith.constant 0 : i32
    %c0_i32_0 = arith.constant 0 : i32
    %c0_i32_1 = arith.constant 0 : i32
    return %c0_i32, %c0_i32_0 : i32, i32
  }
  func.func @transform_5(%arg0: i32) -> (i32, i32) {
    %c0_i32 = arith.constant 0 : i32
    %c0_i32_0 = arith.constant 0 : i32
    %c0_i32_1 = arith.constant 0 : i32
    return %c0_i32, %c0_i32_0 : i32, i32
  }
  func.func @transform_6(%arg0: i32) -> (i32, i32) {
    %c0_i32 = arith.constant 0 : i32
    %c0_i32_0 = arith.constant 0 : i32
    %c0_i32_1 = arith.constant 0 : i32
    return %c0_i32, %c0_i32_0 : i32, i32
  }
  func.func @transform_7(%arg0: i32) -> (i32, i32) {
    %c0_i32 = arith.constant 0 : i32
    %c0_i32_0 = arith.constant 0 : i32
    return %c0_i32, %arg0 : i32, i32
  }
}

</mosaic_0001>

<bundles_post_ra>
// kernel: perceptron_forward.1
= control target key start
LH: loop header
LB: loop body
LE: loop exit
PB: predicated region body
PF: predicated region fallthrough
CT: control target
= control target key end

     0   :  { %s674_s0 = inlined_call_operand.vmem [shape: f32[8,60], index: 0, kind: input, shape index: {}]   ;;  %s675_s1 = inlined_call_operand.vmem [shape: f32[4,60], index: 1, kind: input, shape index: {}]   ;;  %s676_s2 = inlined_call_operand.vmem [shape: f32[4,1], index: 2, kind: input, shape index: {}]   ;;  %s677_s3 = inlined_call_operand.vmem [shape: f32[2,4], index: 3, kind: input, shape index: {}]   ;;  %s678_s4 = inlined_call_operand.vmem [shape: f32[2,1], index: 4, kind: input, shape index: {}]   ;;  %s679_s5 = inlined_call_operand.vmem [shape: f32[1,2], index: 5, kind: input, shape index: {}]   ;;  %s680_s6 = inlined_call_operand.<no memory space> [shape: f32[1,1], index: 6, kind: input, shape index: {}]   ;;  %s681_s7 = inlined_call_operand.hbm [shape: f32[1,8], index: 7, kind: output, shape index: {}]  }
   0x1   :  { %v12_v0 = vstv %s680_s6 }
   0x2   :  { %13 = vst [vmem:[#allocation2] sm:$0x1] %v12_v0 }
   0x3   :  { %v29_v1 = vld [vmem:[%s674_s0] sm:$0xff]  ;;  %v30_v2 = vld [vmem:[%s674_s0 + $0x8] sm:$0xff]  ;;  %vm52_vm0 = vcmask 490496   ;;  %v525_v3 = vmov 0.0|0.0   ;;  %vm526_vm2 = vmmov 0   ;;  %v527_v6 = vmov 0.0  }
   0x4   :  { %456 = vmatprep.subr.bf16.mxu0 %v525_v3  ;;  %v457_v4 = vpack.c.bf16 %v30_v2, %v29_v1  ;;  %vm581_vm1 = vmpackc.low %vm52_vm0, %vm52_vm0  ;;  %443 = vmatprep.mubr.msk.f32.mxu0 %vm526_vm2, %v527_v6  ;;  %v528_v7 = vmov 0   ;;  %v31_v8 = vld [vmem:[%s674_s0 + $0x10] sm:$0xff]  ;;  %v32_v9 = vld [vmem:[%s674_s0 + $0x18] sm:$0xff] }
   0x5   :  { %493 = vset.pattern.permute.xlu0 %v528_v7  ;;  %446 = vmatprep.subr.mxu1 %v527_v6  ;;  %v46_v10 = vld [vmem:[%s676_s2] sm:$0xf] }
   0x6   :  { %459 = vmatpush3.bf16.xpose.msk.msra.mxu0 %vm581_vm1, %v457_v4  ;;  %448 = vmatprep.mubr.msk.f32.mxu1 %vm526_vm2, %v527_v6 }
   0x7   :  { %460 = vmatprep.subr.bf16.mxu0 %v525_v3  ;;  %494 = vset.pattern.permute.xlu1 %v528_v7 }
   0x8   :  { %14 = vsyncpa [#allocation4], 0  ;;  %v461_v11 = vpack.c.bf16 %v32_v9, %v31_v8  ;;  %49 = vperm.xlu0 %493, %v46_v10   ;;  %v176_v12 = vld [vmem:[%s678_s4] sm:$0x3]  ;;  %v34_v14 = vld [vmem:[%s674_s0 + $0x28] sm:$0xff]  ;;  %vm186_vm3 = vcmask 1043456   ;;  %v268_v45 = vlaneseq }
   0x9   :  { %v33_v13 = vld [vmem:[%s674_s0 + $0x20] sm:$0xff]  ;;  %v35_v16 = vld [vmem:[%s674_s0 + $0x30] sm:$0xff]  ;;  %v36_v17 = vld [vmem:[%s674_s0 + $0x38] sm:$0xff]  ;;  %vm182_vm4 = vcmask 31744   ;;  %vm276_vm5 = vcmask 1041408   ;;  %vm272_vm6 = vcmask 15360  }
   0xa   :  { %v465_v15 = vpack.c.bf16 %v34_v14, %v33_v13  ;;  %v469_v18 = vpack.c.bf16 %v36_v17, %v35_v16  ;;  %v37_v19 = vld [vmem:[%s674_s0 + $0x40] sm:$0xff]  ;;  %v38_v20 = vld [vmem:[%s674_s0 + $0x48] sm:$0xff]  ;;  %v39_v22 = vld [vmem:[%s674_s0 + $0x50] sm:$0xff]  ;;  %v269_v46 = vshrl.u32 %v268_v45, 7 }
   0xb   :  { %v473_v21 = vpack.c.bf16 %v38_v20, %v37_v19  ;;  %v40_v23 = vld [vmem:[%s674_s0 + $0x58] sm:$0xff]  ;;  %v41_v25 = vld [vmem:[%s674_s0 + $0x60] sm:$0xff]  ;;  %v42_v26 = vld [vmem:[%s674_s0 + $0x68] sm:$0xff] }
   0xc   :  { %179 = vperm.xlu0 %493, %v176_v12   ;;  %v477_v24 = vpack.c.bf16 %v40_v23, %v39_v22  ;;  %v481_v27 = vpack.c.bf16 %v42_v26, %v41_v25  ;;  %v43_v28 = vld [vmem:[%s674_s0 + $0x70] sm:$0xff]  ;;  %v44_v29 = vld [vmem:[%s674_s0 + $0x78] sm:$0xff]  ;;  %v45_v31 = vld [vmem:[%s675_s1] sm:$0xf]  ;;  %v270_v47 = vsub.s32 0, %v269_v46 }
   0xd   :  { %v485_v30 = vpack.c.bf16 %v44_v29, %v43_v28  ;;  %v175_v36 = vld [vmem:[%s677_s3] sm:$0x3]  ;;  %s529_s3 = smov [#allocation3]  }
   0xe   :  { %463 = vmatpush3.bf16.xpose.msk.msra.mxu0 %vm581_vm1, %v461_v11  ;;  %v262_v38 = vld [vmem:[#allocation2] sm:$0x1]  ;;  %s361_s16 = sshll.u32 %s529_s3, 4  ;;  %s362_s16 = int_to_ptr.vmem [resolvable:$true] %s361_s16 }
   0xf   :  { %464 = vmatprep.subr.bf16.mxu0 %v525_v3  ;;  %265 = vperm.xlu1 %494, %v262_v38   ;;  %v261_v43 = vld [vmem:[%s679_s5] sm:$0x1]  ;;  %s501_s5 = scalar_lea.vmem %s362_s16, 16  ;;  %s505_s17 = scalar_lea.vmem %s362_s16, 32 }
  0x10   :  { %p502_p0 = scmp.ne.s32.totalorder %s362_s16, %s501_s5  ;;  %p506_p1 = scmp.lt.s32.totalorder %s362_s16, %s362_s16 }
  0x11   :  { %p507_p2 = scmp.lt.s32.totalorder %s505_s17, %s501_s5 }
  0x13   :  { %p508_p3 = por %p507_p2, %p506_p1 }
  0x15   :  { %p509_p4 = pnand %p508_p3, %p502_p0 }
  0x16   :  { %467 = vmatpush3.bf16.xpose.msk.msra.mxu0 %vm581_vm1, %v465_v15 }
  0x17   :  { %468 = vmatprep.subr.bf16.mxu0 %v525_v3 }
  0x1e   :  { %471 = vmatpush3.bf16.xpose.msk.msra.mxu0 %vm581_vm1, %v469_v18 }
  0x1f   :  { %472 = vmatprep.subr.bf16.mxu0 %v525_v3 }
  0x26   :  { %475 = vmatpush3.bf16.xpose.msk.msra.mxu0 %vm581_vm1, %v473_v21 }
  0x27   :  { %476 = vmatprep.subr.bf16.mxu0 %v525_v3 }
  0x2e   :  { %479 = vmatpush3.bf16.xpose.msk.msra.mxu0 %vm581_vm1, %v477_v24 }
  0x2f   :  { %480 = vmatprep.subr.bf16.mxu0 %v525_v3 }
  0x36   :  { %483 = vmatpush3.bf16.xpose.msk.msra.mxu0 %vm581_vm1, %v481_v27 }
  0x37   :  { %484 = vmatprep.subr.bf16.mxu0 %v525_v3 }
  0x3e   :  { %487 = vmatpush3.bf16.xpose.msk.msra.mxu0 %vm581_vm1, %v485_v30 }
  0x45   :  { %444 = vmatmul.mubr.msk.f32.vlgmr.msra.gmra.mrb[0].mxu0 %vm52_vm0, %v45_v31 }
  0x87   :  { %v50_v32 = vpop.permute.xlu0 %49 }
  0x8b   :  { %v180_v39 = vpop.permute.xlu0 %179 }
  0x8e   :  { %v266_v48 = vpop.permute.xlu1 %265 }
  0x8f   :  { %v271_v49 = vrot.slane %v266_v48, %v270_v47 }
 0x118   :  { %v170_v33 = vpop.f32.mrb[0].mxu0 }
 0x119   :  { %v171_v34 = vadd.f32 %v170_v33, %v50_v32  ;;  %v445_v35 = vpop.f32.mrb[1].mxu0 }
 0x11b   :  { %495 = vtanh.f32 %v171_v34 }
 0x125   :  { %v496_v37 = vpop.eup %495 }
 0x126   :  { %447 = vmatpush3.msk.msra.mxu1 %vm186_vm3, %v496_v37 }
 0x127   :  { %449 = vmatmul.mubr.msk.f32.vlgmr.msra.gmra.mrb[0].mxu1 %vm182_vm4, %v175_v36  ;;  %451 = vmatprep.subr.mxu1 %v527_v6 }
 0x128   :  { %453 = vmatprep.mubr.msk.f32.mxu1 %vm526_vm2, %v527_v6 }
 0x1fa   :  { %v256_v40 = vpop.f32.mrb[0].mxu1 }
 0x1fb   :  { %v257_v41 = vadd.f32 %v256_v40, %v180_v39  ;;  %v450_v42 = vpop.f32.mrb[1].mxu1 }
 0x1fd   :  { %497 = vtanh.f32 %v257_v41 }
 0x207   :  { %v498_v44 = vpop.eup %497 }
 0x208   :  { %452 = vmatpush3.msk.msra.mxu1 %vm276_vm5, %v498_v44 }
 0x209   :  { %454 = vmatmul.mubr.msk.f32.vlgmr.msra.gmra.mrb[2].mxu1 %vm272_vm6, %v261_v43 }
 0x2dc   :  { %v346_v50 = vpop.f32.mrb[2].mxu1 }
 0x2dd   :  { %v347_v51 = vadd.f32 %v346_v50, %v271_v49  ;;  %v455_v52 = vpop.f32.mrb[3].mxu1 }
 0x2df   :  { %v350_v53 = vmul.f32 0.5, %v347_v51 }
 0x2e1   :  { %499 = vtanh.f32 %v350_v53 }
 0x2eb   :  { %v500_v54 = vpop.eup %499 }
 0x2ec   :  { %v352_v55 = vadd.f32 1.0, %v500_v54 }
 0x2ee   :  { %v353_v56 = vmul.f32 0.5, %v352_v55 }
 0x2f0   :  { %354 = vst [vmem:[#allocation3] sm:$0x1] %v353_v56 }
 0x2f1   :  { %512 = shalt.err (!%p509_p4)
}
 0x2f2   :  { %s513_s18 = scalar_lea.hbm %s681_s7, 16 }
 0x2f3   :  { %p514_p5 = scmp.ne.s32.totalorder %s681_s7, %s513_s18  ;;  %p517_p6 = scmp.lt.u32.totalorder %s513_s18, %s681_s7 }
 0x2f5   :  { %p519_p7 = pnand %p517_p6, %p514_p5 }
 0x2f7   :  { %522 = shalt.err (!%p519_p7)
}
 0x2f8   :  { %364 = dma.vmem_to_hbm [thread:$0]  %s362_s16, 16, %s681_s7, [#allocation4]  }
 0x2f9   :  { %523 = dma.done.wait [#allocation4], 16  }
 0x2fa   :  { %524 = vsyncadd [#allocation4], 4294967280 }
 0x2fb   :  { %368 = vsyncpa [#allocation4], 1 }

</bundles_post_ra>
